<compile_context>
chip_gen: v7x
topology: tpu7x:2x2x1
jax: 0.10.0
libtpu: 0.0.40
codegen_flags: <defaults>
</compile_context>

<pallas_src>
import functools
import math

import numpy as np

import jax
import jax.numpy as jnp
from jax.experimental import pallas as pl
from jax.experimental.pallas import tpu as pltpu

_LANES = 128


# ---------------------------------------------------------------------------
# Pallas kernel: per-observation SE3 action + residual (the forward hot path)
# ---------------------------------------------------------------------------
def _se3_act_residual_kernel(pose_ref, bframe_ref, packed_ref, out_ref):
    # pose_ref:   SMEM (F, 7)          rows = [tx, ty, tz, qx, qy, qz, qw]
    # bframe_ref: SMEM (num_blocks,)   frame id owning each grid block
    # packed_ref: VMEM (6, rows, 128)  rows 0..2 = p_c, 3..5 = p_w
    # out_ref:    VMEM (3, rows, 128)  residual = R(q) @ p_c + t - p_w
    f = bframe_ref[pl.program_id(0)]

    # 7 scalar SMEM reads per block (no per-lane gather / where-chain).
    tx = pose_ref[f, 0]
    ty = pose_ref[f, 1]
    tz = pose_ref[f, 2]
    qx = pose_ref[f, 3]
    qy = pose_ref[f, 4]
    qz = pose_ref[f, 5]
    qw = pose_ref[f, 6]

    px = packed_ref[0]
    py = packed_ref[1]
    pz = packed_ref[2]
    wx = packed_ref[3]
    wy = packed_ref[4]
    wz = packed_ref[5]

    # Quaternion rotation: v' = v + 2*w*(u x v) + 2*u x (u x v),  u = (qx,qy,qz)
    cx = qy * pz - qz * py
    cy = qz * px - qx * pz
    cz = qx * py - qy * px

    ccx = qy * cz - qz * cy
    ccy = qz * cx - qx * cz
    ccz = qx * cy - qy * cx

    # Full (rows, 128) unmasked stores per component.
    out_ref[0] = px + 2.0 * (qw * cx + ccx) + tx - wx
    out_ref[1] = py + 2.0 * (qw * cy + ccy) + ty - wy
    out_ref[2] = pz + 2.0 * (qw * cz + ccz) + tz - wz


# ---------------------------------------------------------------------------
# One-time graph construction (static data: points, edges) — NOT the hot path.
# ---------------------------------------------------------------------------
def build_pose_graph(points_Tc, points_Tw, edges_index, num_frames, *, max_block_rows=1024):
    """Pack the static observation data once.

    Observations are grouped by frame, each frame padded to a whole number of
    blocks, so every grid block belongs to exactly one frame (its id is stored
    per block in SMEM). Returns everything the per-call forward needs plus the
    slot map used to recover original (N, 3) ordering when required.
    """
    edges_np = np.asarray(jax.device_get(edges_index)).astype(np.int64)
    n = int(edges_np.shape[0])

    perm = np.argsort(edges_np, kind="stable")                    # original -> sorted
    counts = np.bincount(edges_np, minlength=num_frames)          # (F,)

    rows_f = [math.ceil(int(c) / _LANES) for c in counts]
    max_rows = max(max(rows_f), 1)
    block_rows = int(min(max_block_rows, ((max_rows + 7) // 8) * 8))
    blocks_f = [math.ceil(r / block_rows) if c > 0 else 0 for r, c in zip(rows_f, counts)]

    total_blocks = max(sum(blocks_f), 1)
    total_rows = total_blocks * block_rows
    n_pad = total_rows * _LANES

    # Per-block frame-id table.
    block_frames = np.concatenate(
        [np.full(blocks_f[f], f, dtype=np.int32) for f in range(num_frames)]
        + [np.zeros(total_blocks - sum(blocks_f), dtype=np.int32)]
    )

    # Flat slot index (into the padded, frame-grouped layout) per original obs.
    slot_sorted = np.zeros(n, dtype=np.int64)
    offset = 0
    base = 0
    for f in range(num_frames):
        c = int(counts[f])
        slot_sorted[offset:offset + c] = base + np.arange(c)
        offset += c
        base += blocks_f[f] * block_rows * _LANES
    slots = np.zeros(n, dtype=np.int64)
    slots[perm] = slot_sorted

    # One-time scatter into the packed (6, rows, 128) slab: [p_c(3), p_w(3)].
    src = jnp.concatenate(
        [jnp.asarray(points_Tc, jnp.float32), jnp.asarray(points_Tw, jnp.float32)], axis=1
    ).T  # (6, N)
    slots_j = jnp.asarray(slots, jnp.int32)
    packed = jnp.zeros((6, n_pad), jnp.float32).at[:, slots_j].set(src)
    packed = packed.reshape(6, total_rows, _LANES)

    return {
        "packed": packed,                                   # (6, rows, 128) device buffer
        "block_frames": jnp.asarray(block_frames),          # (num_blocks,) int32
        "block_rows": block_rows,
        "slots": slots_j,                                   # (N,) int32, for unpacking
        "n": n,
    }


# ---------------------------------------------------------------------------
# Per-iteration forward: only pose2opt changes.
# ---------------------------------------------------------------------------
@functools.partial(jax.jit, static_argnames=("block_rows",))
def pose_graph_forward_packed(pose2opt, packed, block_frames, *, block_rows):
    """Residuals in the packed (3, rows, 128) layout (padding lanes are junk)."""
    total_rows = packed.shape[1]
    grid = (total_rows // block_rows,)
    return pl.pallas_call(
        _se3_act_residual_kernel,
        out_shape=jax.ShapeDtypeStruct((3, total_rows, _LANES), jnp.float32),
        grid=grid,
        in_specs=[
            pl.BlockSpec(memory_space=pltpu.MemorySpace.SMEM),            # pose2opt (F, 7)
            pl.BlockSpec(memory_space=pltpu.MemorySpace.SMEM),            # per-block frame ids
            pl.BlockSpec((6, block_rows, _LANES), lambda i: (0, i, 0)),   # packed observations
        ],
        out_specs=pl.BlockSpec((3, block_rows, _LANES), lambda i: (0, i, 0)),
        compiler_params=pltpu.CompilerParams(
            dimension_semantics=("parallel",),   # independent blocks -> v7x 2-TC sharding
        ),
    )(jnp.asarray(pose2opt, jnp.float32), block_frames.astype(jnp.int32), packed)


def unpack_residuals(out_packed, slots, n):
    """Glue (only when original-order (N, 3) residuals are needed)."""
    flat = out_packed.reshape(3, -1)
    return flat[:, slots].T  # (N, 3), original observation order


# ---------------------------------------------------------------------------
# Init-time glue (registered buffer construction, not the forward hot path)
# ---------------------------------------------------------------------------
def pixel2point_NED(pixels_uv, pixels_d, K):
    """NED back-projection: x = depth (forward), y = right, z = down."""
    fx, fy = K[0, 0], K[1, 1]
    cx, cy = K[0, 2], K[1, 2]
    x = pixels_d
    y = (pixels_uv[..., 0] - cx) * pixels_d / fx
    z = (pixels_uv[..., 1] - cy) * pixels_d / fy
    return jnp.stack([x, y, z], axis=-1)


def _reference_forward(pose2opt, edges_index, points_Tc, points_Tw):
    """Pure-JAX reference (rotation-matrix form) for a correctness check."""
    p = pose2opt[edges_index]
    t, q = p[:, :3], p[:, 3:]
    qx, qy, qz, qw = q[:, 0], q[:, 1], q[:, 2], q[:, 3]
    R = jnp.stack(
        [
            jnp.stack([1 - 2 * (qy * qy + qz * qz), 2 * (qx * qy - qw * qz), 2 * (qx * qz + qw * qy)], -1),
            jnp.stack([2 * (qx * qy + qw * qz), 1 - 2 * (qx * qx + qz * qz), 2 * (qy * qz - qw * qx)], -1),
            jnp.stack([2 * (qx * qz - qw * qy), 2 * (qy * qz + qw * qx), 1 - 2 * (qx * qx + qy * qy)], -1),
        ],
        axis=-2,
    )  # (N, 3, 3)
    rotated = jnp.einsum("nij,nj->ni", R, points_Tc)
    return rotated + t - points_Tw


if __name__ == "__main__":
    key = jax.random.PRNGKey(0)
    k1, k2, k3, k4, k5, k6 = jax.random.split(key, 6)

    F = 2     # frames to optimize (two-frame PGO)
    N = 256   # observations / edges
    H, W = 480, 640

    # Deterministic synthetic "GraphInput" state ----------------------------
    trans = jax.random.normal(k1, (F, 3), jnp.float32)
    quat = jax.random.normal(k2, (F, 4), jnp.float32)
    quat = quat / jnp.linalg.norm(quat, axis=-1, keepdims=True)
    pose2opt = jnp.concatenate([trans, quat], axis=-1)           # (F, 7)

    edges_index = jax.random.randint(k3, (N,), 0, F, jnp.int32)  # (N,)

    K = jnp.array([[320.0, 0.0, W / 2.0],
                   [0.0, 320.0, H / 2.0],
                   [0.0, 0.0, 1.0]], jnp.float32)
    pixel2_uv = jax.random.uniform(k4, (N, 2), jnp.float32,
                                   minval=0.0, maxval=1.0) * jnp.array([W, H], jnp.float32)
    pixel2_d = jax.random.uniform(k5, (N,), jnp.float32, minval=1.0, maxval=10.0)
    points_Tc = pixel2point_NED(pixel2_uv, pixel2_d, K)           # (N, 3) buffer
    points_Tw = jax.random.normal(k6, (N, 3), jnp.float32)        # (N, 3) buffer

    # One-time packing (static data) -----------------------------------------
    graph = build_pose_graph(points_Tc, points_Tw, edges_index, F)

    # Per-iteration forward (only pose2opt changes) ---------------------------
    out_packed = pose_graph_forward_packed(
        pose2opt, graph["packed"], graph["block_frames"], block_rows=graph["block_rows"]
    )
    out_packed = jax.block_until_ready(out_packed)

    # Unpack (glue, used only where original (N, 3) order is required).
    out = unpack_residuals(out_packed, graph["slots"], graph["n"])
    assert out.shape == (N, 3) and out.dtype == jnp.float32

    ref = _reference_forward(pose2opt, edges_index, points_Tc, points_Tw)
    assert jnp.allclose(out, ref, atol=1e-4, rtol=1e-4)

    print("KERNEL_OK")
</pallas_src>

<mosaic_0001>
module attributes {stable_mosaic.version = 11 : i64} {
  func.func @_se3_act_residual_kernel(%arg0: i32, %arg1: memref<2x7xf32, #tpu.memory_space<smem>>, %arg2: memref<2xi32, #tpu.memory_space<smem>>, %arg3: memref<6x8x128xf32, #tpu.memory_space<vmem>>, %arg4: memref<3x8x128xf32, #tpu.memory_space<vmem>>) attributes {dimension_semantics = [#tpu.dimension_semantics<parallel>], iteration_bounds = array<i64: 2>, scalar_prefetch = 0 : i64, scratch_operands = 0 : i64, tpu.core_type = #tpu.core_type<tc>, window_params = [{transform_indices = @transform_0, window_bounds = array<i64: 2, 7>}, {transform_indices = @transform_1, window_bounds = array<i64: 2>}, {transform_indices = @transform_2, window_bounds = array<i64: 6, 8, 128>}, {transform_indices = @transform_3, window_bounds = array<i64: 3, 8, 128>}]} {
    %0 = arith.index_cast %arg0 : i32 to index
    %1 = memref.load %arg2[%0] : memref<2xi32, #tpu.memory_space<smem>>
    %2 = arith.index_cast %1 : i32 to index
    %c0 = arith.constant 0 : index
    %3 = memref.load %arg1[%2, %c0] : memref<2x7xf32, #tpu.memory_space<smem>>
    %4 = arith.index_cast %1 : i32 to index
    %c1 = arith.constant 1 : index
    %5 = memref.load %arg1[%4, %c1] : memref<2x7xf32, #tpu.memory_space<smem>>
    %6 = arith.index_cast %1 : i32 to index
    %c2 = arith.constant 2 : index
    %7 = memref.load %arg1[%6, %c2] : memref<2x7xf32, #tpu.memory_space<smem>>
    %8 = arith.index_cast %1 : i32 to index
    %c3 = arith.constant 3 : index
    %9 = memref.load %arg1[%8, %c3] : memref<2x7xf32, #tpu.memory_space<smem>>
    %10 = arith.index_cast %1 : i32 to index
    %c4 = arith.constant 4 : index
    %11 = memref.load %arg1[%10, %c4] : memref<2x7xf32, #tpu.memory_space<smem>>
    %12 = arith.index_cast %1 : i32 to index
    %c5 = arith.constant 5 : index
    %13 = memref.load %arg1[%12, %c5] : memref<2x7xf32, #tpu.memory_space<smem>>
    %14 = arith.index_cast %1 : i32 to index
    %c6 = arith.constant 6 : index
    %15 = memref.load %arg1[%14, %c6] : memref<2x7xf32, #tpu.memory_space<smem>>
    %c0_0 = arith.constant 0 : index
    %c0_1 = arith.constant 0 : index
    %c0_2 = arith.constant 0 : index
    %16 = vector.load %arg3[%c0_0, %c0_1, %c0_2] : memref<6x8x128xf32, #tpu.memory_space<vmem>>, vector<1x8x128xf32>
    %17 = vector.shape_cast %16 : vector<1x8x128xf32> to vector<8x128xf32>
    %c1_3 = arith.constant 1 : index
    %c0_4 = arith.constant 0 : index
    %c0_5 = arith.constant 0 : index
    %18 = vector.load %arg3[%c1_3, %c0_4, %c0_5] : memref<6x8x128xf32, #tpu.memory_space<vmem>>, vector<1x8x128xf32>
    %19 = vector.shape_cast %18 : vector<1x8x128xf32> to vector<8x128xf32>
    %c2_6 = arith.constant 2 : index
    %c0_7 = arith.constant 0 : index
    %c0_8 = arith.constant 0 : index
    %20 = vector.load %arg3[%c2_6, %c0_7, %c0_8] : memref<6x8x128xf32, #tpu.memory_space<vmem>>, vector<1x8x128xf32>
    %21 = vector.shape_cast %20 : vector<1x8x128xf32> to vector<8x128xf32>
    %c3_9 = arith.constant 3 : index
    %c0_10 = arith.constant 0 : index
    %c0_11 = arith.constant 0 : index
    %22 = vector.load %arg3[%c3_9, %c0_10, %c0_11] : memref<6x8x128xf32, #tpu.memory_space<vmem>>, vector<1x8x128xf32>
    %23 = vector.shape_cast %22 : vector<1x8x128xf32> to vector<8x128xf32>
    %c4_12 = arith.constant 4 : index
    %c0_13 = arith.constant 0 : index
    %c0_14 = arith.constant 0 : index
    %24 = vector.load %arg3[%c4_12, %c0_13, %c0_14] : memref<6x8x128xf32, #tpu.memory_space<vmem>>, vector<1x8x128xf32>
    %25 = vector.shape_cast %24 : vector<1x8x128xf32> to vector<8x128xf32>
    %c5_15 = arith.constant 5 : index
    %c0_16 = arith.constant 0 : index
    %c0_17 = arith.constant 0 : index
    %26 = vector.load %arg3[%c5_15, %c0_16, %c0_17] : memref<6x8x128xf32, #tpu.memory_space<vmem>>, vector<1x8x128xf32>
    %27 = vector.shape_cast %26 : vector<1x8x128xf32> to vector<8x128xf32>
    %28 = vector.broadcast %11 : f32 to vector<8x128xf32>
    %29 = arith.mulf %28, %21 : vector<8x128xf32>
    %30 = vector.broadcast %13 : f32 to vector<8x128xf32>
    %31 = arith.mulf %30, %19 : vector<8x128xf32>
    %32 = arith.subf %29, %31 : vector<8x128xf32>
    %33 = vector.broadcast %13 : f32 to vector<8x128xf32>
    %34 = arith.mulf %33, %17 : vector<8x128xf32>
    %35 = vector.broadcast %9 : f32 to vector<8x128xf32>
    %36 = arith.mulf %35, %21 : vector<8x128xf32>
    %37 = arith.subf %34, %36 : vector<8x128xf32>
    %38 = vector.broadcast %9 : f32 to vector<8x128xf32>
    %39 = arith.mulf %38, %19 : vector<8x128xf32>
    %40 = vector.broadcast %11 : f32 to vector<8x128xf32>
    %41 = arith.mulf %40, %17 : vector<8x128xf32>
    %42 = arith.subf %39, %41 : vector<8x128xf32>
    %43 = vector.broadcast %11 : f32 to vector<8x128xf32>
    %44 = arith.mulf %43, %42 : vector<8x128xf32>
    %45 = vector.broadcast %13 : f32 to vector<8x128xf32>
    %46 = arith.mulf %45, %37 : vector<8x128xf32>
    %47 = arith.subf %44, %46 : vector<8x128xf32>
    %48 = vector.broadcast %13 : f32 to vector<8x128xf32>
    %49 = arith.mulf %48, %32 : vector<8x128xf32>
    %50 = vector.broadcast %9 : f32 to vector<8x128xf32>
    %51 = arith.mulf %50, %42 : vector<8x128xf32>
    %52 = arith.subf %49, %51 : vector<8x128xf32>
    %53 = vector.broadcast %9 : f32 to vector<8x128xf32>
    %54 = arith.mulf %53, %37 : vector<8x128xf32>
    %55 = vector.broadcast %11 : f32 to vector<8x128xf32>
    %56 = arith.mulf %55, %32 : vector<8x128xf32>
    %57 = arith.subf %54, %56 : vector<8x128xf32>
    %58 = vector.broadcast %15 : f32 to vector<8x128xf32>
    %59 = arith.mulf %58, %32 : vector<8x128xf32>
    %60 = arith.addf %59, %47 : vector<8x128xf32>
    %cst = arith.constant 2.000000e+00 : f32
    %61 = vector.broadcast %cst : f32 to vector<8x128xf32>
    %62 = arith.mulf %61, %60 : vector<8x128xf32>
    %63 = arith.addf %17, %62 : vector<8x128xf32>
    %64 = vector.broadcast %3 : f32 to vector<8x128xf32>
    %65 = arith.addf %63, %64 : vector<8x128xf32>
    %66 = arith.subf %65, %23 : vector<8x128xf32>
    %c0_18 = arith.constant 0 : index
    %c0_19 = arith.constant 0 : index
    %c0_20 = arith.constant 0 : index
    %67 = vector.load %arg4[%c0_18, %c0_19, %c0_20] : memref<3x8x128xf32, #tpu.memory_space<vmem>>, vector<1x8x128xf32>
    %68 = vector.shape_cast %67 : vector<1x8x128xf32> to vector<8x128xf32>
    %69 = vector.shape_cast %66 : vector<8x128xf32> to vector<1x8x128xf32>
    tpu.vector_store %arg4[%c0_18, %c0_19, %c0_20], %69 {strides = array<i32>} : memref<3x8x128xf32, #tpu.memory_space<vmem>>, vector<1x8x128xf32>,
    %70 = vector.broadcast %15 : f32 to vector<8x128xf32>
    %71 = arith.mulf %70, %37 : vector<8x128xf32>
    %72 = arith.addf %71, %52 : vector<8x128xf32>
    %cst_21 = arith.constant 2.000000e+00 : f32
    %73 = vector.broadcast %cst_21 : f32 to vector<8x128xf32>
    %74 = arith.mulf %73, %72 : vector<8x128xf32>
    %75 = arith.addf %19, %74 : vector<8x128xf32>
    %76 = vector.broadcast %5 : f32 to vector<8x128xf32>
    %77 = arith.addf %75, %76 : vector<8x128xf32>
    %78 = arith.subf %77, %25 : vector<8x128xf32>
    %c1_22 = arith.constant 1 : index
    %c0_23 = arith.constant 0 : index
    %c0_24 = arith.constant 0 : index
    %79 = vector.load %arg4[%c1_22, %c0_23, %c0_24] : memref<3x8x128xf32, #tpu.memory_space<vmem>>, vector<1x8x128xf32>
    %80 = vector.shape_cast %79 : vector<1x8x128xf32> to vector<8x128xf32>
    %81 = vector.shape_cast %78 : vector<8x128xf32> to vector<1x8x128xf32>
    tpu.vector_store %arg4[%c1_22, %c0_23, %c0_24], %81 {strides = array<i32>} : memref<3x8x128xf32, #tpu.memory_space<vmem>>, vector<1x8x128xf32>,
    %82 = vector.broadcast %15 : f32 to vector<8x128xf32>
    %83 = arith.mulf %82, %42 : vector<8x128xf32>
    %84 = arith.addf %83, %57 : vector<8x128xf32>
    %cst_25 = arith.constant 2.000000e+00 : f32
    %85 = vector.broadcast %cst_25 : f32 to vector<8x128xf32>
    %86 = arith.mulf %85, %84 : vector<8x128xf32>
    %87 = arith.addf %21, %86 : vector<8x128xf32>
    %88 = vector.broadcast %7 : f32 to vector<8x128xf32>
    %89 = arith.addf %87, %88 : vector<8x128xf32>
    %90 = arith.subf %89, %27 : vector<8x128xf32>
    %c2_26 = arith.constant 2 : index
    %c0_27 = arith.constant 0 : index
    %c0_28 = arith.constant 0 : index
    %91 = vector.load %arg4[%c2_26, %c0_27, %c0_28] : memref<3x8x128xf32, #tpu.memory_space<vmem>>, vector<1x8x128xf32>
    %92 = vector.shape_cast %91 : vector<1x8x128xf32> to vector<8x128xf32>
    %93 = vector.shape_cast %90 : vector<8x128xf32> to vector<1x8x128xf32>
    tpu.vector_store %arg4[%c2_26, %c0_27, %c0_28], %93 {strides = array<i32>} : memref<3x8x128xf32, #tpu.memory_space<vmem>>, vector<1x8x128xf32>,
    return
  }
  func.func @transform_0(%arg0: i32) -> (i32, i32) {
    %c0_i32 = arith.constant 0 : i32
    %c0_i32_0 = arith.constant 0 : i32
    %c0_i32_1 = arith.constant 0 : i32
    return %c0_i32, %c0_i32_0 : i32, i32
  }
  func.func @transform_1(%arg0: i32) -> i32 {
    %c0_i32 = arith.constant 0 : i32
    %c0_i32_0 = arith.constant 0 : i32
    return %c0_i32 : i32
  }
  func.func @transform_2(%arg0: i32) -> (i32, i32, i32) {
    %c0_i32 = arith.constant 0 : i32
    %c0_i32_0 = arith.constant 0 : i32
    %c0_i32_1 = arith.constant 0 : i32
    return %c0_i32, %arg0, %c0_i32_0 : i32, i32, i32
  }
  func.func @transform_3(%arg0: i32) -> (i32, i32, i32) {
    %c0_i32 = arith.constant 0 : i32
    %c0_i32_0 = arith.constant 0 : i32
    %c0_i32_1 = arith.constant 0 : i32
    return %c0_i32, %arg0, %c0_i32_0 : i32, i32, i32
  }
}

</mosaic_0001>

<bundles_post_ra>
// kernel: pose_graph_forward_packed.1
= control target key start
LH: loop header
LB: loop body
LE: loop exit
PB: predicated region body
PF: predicated region fallthrough
CT: control target
= control target key end

     0   :  { %8 = vsyncpa [#allocation5], 0  ;;  %s889_s0 = inlined_call_operand.hbm [shape: f32[2,7], index: 0, kind: input, shape index: {}]   ;;  %s890_s1 = inlined_call_operand.vmem [shape: s32[2], index: 1, kind: input, shape index: {}]   ;;  %s891_s2 = inlined_call_operand.hbm [shape: f32[6,16,128], index: 2, kind: input, shape index: {}]   ;;  %s892_s3 = inlined_call_operand.hbm [shape: f32[3,16,128], index: 3, kind: output, shape index: {}]  }
   0x1   :  { %9 = vsyncpa [#allocation6], 0 }
   0x2   :  { %10 = vsyncpa [#allocation3], 0 }
   0x3   :  { %12 = vsyncpa [#allocation3 + $0x1], 0 }
   0x4   :  { %13 = vsyncpa [#allocation4], 0 }
   0x5   :  { %15 = vsyncpa [#allocation4 + $0x1], 0  ;;  %s657_s12 = smov 0   ;;  %s659_s13 = smov 0  }
   0x6   :  { %s661_s14 = smov 0   ;;  %s663_s15 = smov 0  }
   0x7 LB: > { %s678_s16 = sadd.s32 4294967295, %s625_s15   ;;  %s397_s17 = sadd.s32 4294967294, %s625_s15   ;;  %s625_s15 = sphi %s663_s15, %s915_s15   ;;  %s621_s14 = sphi %s661_s14, %s914_s14   ;;  %s617_s13 = sphi %s659_s13, %s913_s13   ;;  %s613_s12 = sphi %s657_s12, %s912_s12  }
   0x8   : > { %s682_s18 = sadd.s32 1, %s625_s15   ;;  %s70_s19 = sadd.s32 1, %s621_s14 }
   0x9   : > { %s67_s20 = ssub.s32 %s625_s15, %s682_s18  ;;  %p77_p0 = scmp.ne.s32.totalorder %s621_s14, %s617_s13 }
   0xa   : > { %p68_p1 = scmp.eq.s32.totalorder %s67_s20, 0  ;;  %p78_p2 = scmp.eq.s32.totalorder %s625_s15, 0 }
   0xb   : > { %p83_p3 = scmp.ne.s32.totalorder %s617_s13, %s613_s12  ;;  %p893_p4 = scmp.eq.s32.totalorder %s678_s16, 0 }
   0xc   : > { %s694_s21 = scalar_select %p68_p1, %s621_s14, %s70_s19  }
   0xd   : > { %p696_p5 = por %p78_p2, %p77_p0  ;;  %p702_p6 = por %p893_p4, %p83_p3 }
   0xe   : > { %p107_p7 = scmp.eq.s32.totalorder %s678_s16, 1  ;;  %p113_p8 = scmp.eq.s32.totalorder %s397_s17, 1 }
   0xf   : > { %s897_s23 = scalar_select %p702_p6, 1, 0 }
  0x10   : > { %p398_p9 = scmp.ge.s32.totalorder %s625_s15, 1  ;;  %p120_p10 = scmp.lt.s32.totalorder %s625_s15, 3 }
  0x11   : > { %p709_p11 = por %p107_p7, %p77_p0  ;;  %p713_p12 = por %p113_p8, %p83_p3 }
  0x12   : > { %p717_p13 = pnand %p398_p9, %p120_p10  ;;  %p449_p4 = scmp.lt.s32.totalorder %s625_s15, 2 }
  0x13   : > { %s898_s24 = scalar_select %p709_p11, 1, 0 }
  0x14   : > { %s899_s25 = scalar_select %p713_p12, 1, 0 }
  0x15   : > { %p432_p2 = pneg %p717_p13  ;;  %s142_s29 = sshll.u32 %s890_s1, 4  ;;  %s143_s29 = int_to_ptr.vmem [resolvable:$true] %s142_s29 }
  0x16   : > { %p901_p0 = scmp.eq.s32.totalorder %s678_s16, 0  ;;  %p736_p3 = pnand %p449_p4, %p696_p5 }
  0x17   : > { %s153_s5 = sand.u32 1, %s621_s14   ;;  %s493_s8 = scalar_lea.hbm %s889_s0, 32 }
  0x18   : > { %p730_p7 = pnand %p432_p2, %p901_p0  ;;  %p494_p8 = scmp.ne.s32.totalorder %s889_s0, %s493_s8 }
  0x19   : > { %p500_p4 = scmp.lt.u32.totalorder %s493_s8, %s889_s0 }
  0x1a   : > { %p495_p9 = pneg %p730_p7 }
  0x1c   : > { %p496_p10 = pnand %p495_p9, %p494_p8 }
  0x1e   : > { %p497_p2 = pneg %p496_p10 }
  0x20   : > { %p502_p5 = pnand %p500_p4, %p497_p2 }
  0x22   : > { %505 = shalt.err (!%p502_p5)
}
  0x23   : > { %s627_s19 = smov [#allocation2]   ;;  %s506_s27 = scalar_lea.vmem %s143_s29, 16 }
  0x24   : > { %435 = dma.hbm_to_smem (!%p730_p7), %s889_s0, 32, %s627_s19, [#allocation5]  }
  0x25   : > { %p507_p0 = scmp.ne.s32.totalorder %s143_s29, %s506_s27  ;;  %p514_p11 = scmp.lt.s32.totalorder %s143_s29, %s143_s29 }
  0x26   : > { %p515_p8 = scmp.lt.s32.totalorder %s506_s27, %s506_s27 }
  0x27   : > { %p509_p1 = pnand %p507_p0, %p495_p9 }
  0x28   : > { %p516_p10 = por %p515_p8, %p514_p11 }
  0x29   : > { %p510_p12 = pneg %p509_p1 }
  0x2b   : > { %p517_p6 = pnand %p516_p10, %p510_p12 }
  0x2d   : > { %520 = shalt.err (!%p517_p6)
}
  0x2e   : > { %s628_s28 = smov [#allocation7]   ;;  %s417_s6 = smul.u32 48, %s153_s5 }
  0x2f   : > { %438 = dma.vmem_to_smem (!%p730_p7), %s143_s29, 16, %s628_s28, [#allocation6]  }
  0x30   : > { %s402_s7 = sshll.u32 %s625_s15, 7  ;;  %s157_s11 = scalar_lea.vmem [#allocation8], %s417_s6 }
  0x31   : > { %s763_s10 = scalar_lea.hbm %s891_s2, %s402_s7  ;;  %s163_s17 = sshll.u32 %s157_s11, 4  ;;  %s765_s17 = int_to_ptr.vmem [resolvable:$true] %s163_s17 }
  0x32   : > { %s767_s30 = scalar_lea.sflag [#allocation3], %s153_s5  ;;  %s521_s19 = scalar_lea.hbm %s763_s10, 768 }
  0x33   : > { %p522_p6 = scmp.ne.s32.totalorder %s763_s10, %s521_s19  ;;  %p523_p11 = pneg %p736_p3 }
  0x34   : > { %s526_s22 = scalar_lea.hbm %s891_s2, 1536  ;;  %p527_p7 = scmp.lt.u32.totalorder %s763_s10, %s891_s2 }
  0x35   : > { %p524_p12 = pnand %p523_p11, %p522_p6  ;;  %p528_p9 = scmp.lt.u32.totalorder %s526_s22, %s521_s19 }
  0x36   : > { %p530_p4 = scmp.lt.u32.totalorder %s521_s19, %s763_s10 }
  0x37   : > { %p525_p1 = pneg %p524_p12  ;;  %p529_p2 = por %p528_p9, %p527_p7 }
  0x39   : > { %p531_p5 = por %p530_p4, %p529_p2 }
  0x3b   : > { %p532_p0 = pnand %p531_p5, %p525_p1 }
  0x3d   : > { %535 = shalt.err (!%p532_p0)
}
  0x3e   : > { %s536_s5 = scalar_lea.vmem %s765_s17, 768  ;;  %s629_s6 = smov [#allocation8]  }
  0x3f   : > { %p537_p8 = scmp.ne.s32.totalorder %s765_s17, %s536_s5  ;;  %s541_s7 = sshll.u32 %s629_s6, 4  ;;  %s542_s7 = int_to_ptr.vmem [resolvable:$false] %s541_s7 }
  0x40   : > { %s543_s8 = scalar_lea.vmem %s542_s7, 1536  ;;  %p544_p12 = scmp.lt.s32.totalorder %s765_s17, %s542_s7 }
  0x41   : > { %p539_p10 = pnand %p537_p8, %p523_p11  ;;  %p545_p7 = scmp.lt.s32.totalorder %s543_s8, %s536_s5 }
  0x43   : > { %p540_p6 = pneg %p539_p10  ;;  %p546_p9 = por %p545_p7, %p544_p12 }
  0x45   : > { %p547_p2 = pnand %p546_p9, %p540_p6 }
  0x47   : > { %550 = shalt.err (!%p547_p2)
}
  0x48   : > { %s630_s9 = smov 256   ;;  %s631_s11 = smov 128  }
  0x49   : > { %s632_s19 = smov 8   ;;  %175 = sbr.rel (%p717_p13) target bundleno = 144 (0x90), region = 32 }
  0x4a   : > { %442 = dma.hbm_to_vmem [thread:$0]  (!%p736_p3), %s763_s10, 768, %s765_s17, %s767_s30, %s630_s9, %s631_s11, %s632_s19  }
  0x4b   : > { %p904_p11 = scmp.eq.s32.totalorder (!%p717_p13), %s678_s16, 0 }
  0x50   : > { %596 = dma.done.wait (%p904_p11), [#allocation5], 32   ;;  %p905_p1 = pmov %p904_p11 }
  0x52   : > { %598 = vsyncadd (%p905_p1), [#allocation5], 4294967264  ;;  %p906_p4 = pmov %p905_p1 }
  0x53   : > { %p907_p5 = pmov %p905_p1 }
  0x54   : > { %600 = dma.done.wait (%p906_p4), [#allocation6], 16  }
  0x55   : > { %602 = vsyncadd (%p907_p5), [#allocation6], 4294967280  ;;  %s806_s29 = sand.u32 1, %s617_s13   ;;  %p908_p13 = scmp.ne.s32.totalorder %s897_s23, 0 }
  0x56   : > { %s418_s26 = smul.u32 48, %s806_s29  ;;  %s186_s4 = scalar_lea.sflag [#allocation3], %s806_s29 }
  0x58   : > { %s810_s10 = scalar_lea.vmem [#allocation8], %s418_s26 }
  0x59   : > { %604 = dma.done.wait (%p908_p13), %s186_s4, 768  }
  0x5a   : > { %606 = vsyncadd (%p908_p13), %s186_s4, 4294966528 }
  0x5b   : > { %194 = sfence }
  0x5c   : > { %s213_s17 = sld [smem:[#allocation7 + %s678_s16]]  ;;  %v407_v0 = vld [vmem:[%s810_s10 + $0x8] sm:$0xff]  ;;  %v408_v1 = vld [vmem:[%s810_s10 + $0x10] sm:$0xff]  ;;  %v228_v2 = vld [vmem:[%s810_s10] sm:$0xff]  ;;  %s419_s4 = smul.u32 24, %s806_s29 }
  0x5d   : > { %v409_v39 = vld [vmem:[%s810_s10 + $0x18] sm:$0xff]  ;;  %v410_v40 = vld [vmem:[%s810_s10 + $0x20] sm:$0xff]  ;;  %v411_v44 = vld [vmem:[%s810_s10 + $0x28] sm:$0xff]  ;;  %p909_p0 = scmp.ne.s32.totalorder %s898_s24, 0  ;;  %s633_s10 = smov [#allocation9]  }
  0x62   : > { %s817_s30 = sshll.u32 %s213_s17, 7  ;;  %s414_s17 = sshll.u32 %s678_s16, 7 }
  0x63   : > { %s220_s20 = sadd.s32 3, %s817_s30  ;;  %s222_s27 = sadd.s32 4, %s817_s30 }
  0x64   : > { %s221_s22 = sld [smem:[#allocation2 + %s220_s20]]  ;;  %s224_s5 = sadd.s32 5, %s817_s30 }
  0x65   : > { %s223_s28 = sld [smem:[#allocation2 + %s222_s27]]  ;;  %s226_s6 = sadd.s32 6, %s817_s30 }
  0x66   : > { %s225_s23 = sld [smem:[#allocation2 + %s224_s5]]  ;;  %s216_s8 = sadd.s32 1, %s817_s30 }
  0x67   : > { %s227_s7 = sld [smem:[#allocation2 + %s226_s6]]  ;;  %s218_s9 = sadd.s32 2, %s817_s30 }
  0x68   : > { %s829_s11 = sld [smem:[#allocation2 + %s817_s30]]  ;;  %s212_s30 = scalar_lea.vmem [#allocation9], %s419_s4 }
  0x69   : > { %s831_s19 = sld [smem:[#allocation2 + %s216_s8]]  ;;  %s300_s20 = sshll.u32 %s212_s30, 4  ;;  %s845_s20 = int_to_ptr.vmem [resolvable:$true] %s300_s20 }
  0x6a   : > { %v245_v3 = vstv %s221_s22  ;;  %s219_s26 = sld [smem:[#allocation2 + %s218_s9]]  ;;  %s288_s16 = scalar_lea.sflag [#allocation4], %s806_s29 }
  0x6b   : > { %v239_v4 = vstv %s223_s28  ;;  %v246_v5 = vmul.f32 %v408_v1, %v245_v3  ;;  %v248_v6 = vmul.f32 %v407_v0, %v245_v3  ;;  %s843_s28 = scalar_lea.hbm %s892_s3, %s414_s17  ;;  %s551_s5 = scalar_lea.vmem %s845_s20, 384 }
  0x6c   : > { %v240_v7 = vmul.f32 %v408_v1, %v239_v4  ;;  %v241_v8 = vstv %s225_s23  ;;  %v249_v9 = vmul.f32 %v239_v4, %v228_v2  ;;  %p552_p3 = scmp.ne.s32.totalorder %s845_s20, %s551_s5  ;;  %s555_s23 = sshll.u32 %s633_s10, 4  ;;  %s556_s23 = int_to_ptr.vmem [resolvable:$false] %s555_s23 }
  0x6d   : > { %v242_v10 = vmul.f32 %v407_v0, %v241_v8  ;;  %v244_v11 = vmul.f32 %v241_v8, %v228_v2  ;;  %v260_v13 = vstv %s227_s7  ;;  %s557_s6 = scalar_lea.vmem %s556_s23, 768  ;;  %p558_p6 = scmp.lt.s32.totalorder %s845_s20, %s556_s23 }
  0x6e   : > { %v250_v12 = vsub.f32 %v248_v6, %v249_v9  ;;  %v265_v33 = vstv %s829_s11  ;;  %p553_p8 = pnand %p552_p3, %p909_p0  ;;  %p559_p12 = scmp.lt.s32.totalorder %s557_s6, %s551_s5 }
  0x6f   : > { %v243_v14 = vsub.f32 %v240_v7, %v242_v10  ;;  %v247_v15 = vsub.f32 %v244_v11, %v246_v5  ;;  %v273_v34 = vstv %s831_s19 }
  0x70   : > { %v251_v16 = vmul.f32 %v250_v12, %v239_v4  ;;  %v255_v17 = vmul.f32 %v250_v12, %v245_v3  ;;  %v278_v24 = vmul.f32 %v260_v13, %v250_v12  ;;  %v282_v38 = vstv %s219_s26  ;;  %p554_p10 = pneg %p553_p8  ;;  %p560_p7 = por %p559_p12, %p558_p6 }
  0x71   : > { %v252_v18 = vmul.f32 %v247_v15, %v241_v8  ;;  %v261_v19 = vmul.f32 %v260_v13, %v243_v14  ;;  %v254_v20 = vmul.f32 %v243_v14, %v241_v8  ;;  %v269_v21 = vmul.f32 %v260_v13, %v247_v15 }
  0x72   : > { %v257_v22 = vmul.f32 %v247_v15, %v245_v3  ;;  %v258_v23 = vmul.f32 %v243_v14, %v239_v4  ;;  %p561_p9 = pnand %p560_p7, %p554_p10 }
  0x73   : > { %v253_v25 = vsub.f32 %v251_v16, %v252_v18  ;;  %v256_v26 = vsub.f32 %v254_v20, %v255_v17 }
  0x74   : > { %v259_v27 = vsub.f32 %v257_v22, %v258_v23 }
  0x75   : > { %v262_v28 = vadd.f32 %v261_v19, %v253_v25  ;;  %v270_v29 = vadd.f32 %v269_v21, %v256_v26 }
  0x76   : > { %v279_v30 = vadd.f32 %v278_v24, %v259_v27 }
  0x77   : > { %v263_v31 = vmul.f32 2.0, %v262_v28  ;;  %v271_v32 = vmul.f32 2.0, %v270_v29 }
  0x78   : > { %v280_v35 = vmul.f32 2.0, %v279_v30 }
  0x79   : > { %v264_v36 = vadd.f32 %v263_v31, %v228_v2  ;;  %v272_v37 = vadd.f32 %v407_v0, %v271_v32 }
  0x7a   : > { %v281_v41 = vadd.f32 %v408_v1, %v280_v35 }
  0x7b   : > { %v266_v42 = vadd.f32 %v265_v33, %v264_v36  ;;  %v274_v43 = vadd.f32 %v273_v34, %v272_v37 }
  0x7c   : > { %v283_v45 = vadd.f32 %v282_v38, %v281_v41 }
  0x7d   : > { %v267_v46 = vsub.f32 %v266_v42, %v409_v39  ;;  %v275_v47 = vsub.f32 %v274_v43, %v410_v40 }
  0x7e   : > { %v284_v48 = vsub.f32 %v283_v45, %v411_v44 }
  0x7f   : > { %268 = vst [vmem:[%s212_s30] sm:$0xff] %v267_v46  ;;  %412 = vst [vmem:[%s212_s30 + $0x8] sm:$0xff] %v275_v47 }
  0x80   : > { %413 = vst [vmem:[%s212_s30 + $0x10] sm:$0xff] %v284_v48 }
  0x81   : > { %564 = shalt.err (!%p561_p9)
}
  0x82   : > { %s565_s7 = scalar_lea.hbm %s843_s28, 384  ;;  %s569_s11 = scalar_lea.hbm %s892_s3, 768 }
  0x83   : > { %p566_p2 = scmp.ne.s32.totalorder %s843_s28, %s565_s7  ;;  %p570_p4 = scmp.lt.u32.totalorder %s843_s28, %s892_s3 }
  0x84   : > { %p571_p5 = scmp.lt.u32.totalorder %s569_s11, %s565_s7  ;;  %p573_p3 = scmp.lt.u32.totalorder %s565_s7, %s843_s28 }
  0x85   : > { %p567_p11 = pnand %p566_p2, %p909_p0 }
  0x86   : > { %p572_p13 = por %p571_p5, %p570_p4 }
  0x87   : > { %p568_p1 = pneg %p567_p11 }
  0x88   : > { %p574_p8 = por %p573_p3, %p572_p13 }
  0x8a   : > { %p575_p10 = pnand %p574_p8, %p568_p1 }
  0x8c   : > { %578 = shalt.err (!%p575_p10)
}
  0x8d   : > { %s634_s4 = smov 128   ;;  %s635_s17 = smov 256  }
  0x8e   : > { %s636_s30 = smov 8  }
  0x8f   : > { %430 = dma.vmem_to_hbm [thread:$0]  (%p909_p0), %s845_s20, 384, %s843_s28, %s288_s16, %s634_s4, %s635_s17, %s636_s30  }
  0x90 PF: > { %s315_s22 = sand.u32 1, %s613_s12   ;;  %p910_p6 = scmp.ne.s32.totalorder %s899_s25, 0 }
  0x91   : > { %p911_p12 = scmp.ge.s32.totalorder %s625_s15, 2  ;;  %s316_s27 = scalar_lea.sflag [#allocation4], %s315_s22 }
  0x93   : > { %p444_p7 = pnand %p911_p12, %p910_p6 }
  0x95   : > { %608 = dma.done.wait (!%p444_p7), %s316_s27, 384  }
  0x96   : > { %610 = vsyncadd (!%p444_p7), %s316_s27, 4294966912  ;;  %p18_p9 = scmp.ge.s32.totalorder %s682_s18, 4   ;;  %s912_s12 = smov %s617_s13 }
  0x97   : > { %s913_s13 = smov %s621_s14  ;;  %s914_s14 = smov %s694_s21 }
  0x98   : > { %s915_s15 = smov %s682_s18  ;;  %20 = sbr.rel (!%p18_p9) target bundleno = 7 (0x7), region = 94 }
  0x9f   :  { %321 = vsyncpa [#allocation3], 1 }
  0xa0   :  { %323 = vsyncpa [#allocation3 + $0x1], 1 }
  0xa1   :  { %324 = vsyncpa [#allocation4], 1 }
  0xa2   :  { %326 = vsyncpa [#allocation4 + $0x1], 1 }
  0xa3   :  { %327 = vsyncpa [#allocation5], 1 }
  0xa4   :  { %329 = vsyncpa [#allocation5 + $0x1], 1 }
  0xa5   :  { %330 = vsyncpa [#allocation6], 1 }
  0xa6   :  { %332 = vsyncpa [#allocation6 + $0x1], 1 }

</bundles_post_ra>
